<compile_context>
chip_gen: v7x
topology: tpu7x:2x2x1
jax: 0.10.0
libtpu: 0.0.40
codegen_flags: <defaults>
</compile_context>

<pallas_src>
import math

import jax
import jax.numpy as jnp
from jax.experimental import pallas as pl
from jax.experimental.pallas import tpu as pltpu


def _add_pe_kernel(pe_ref, x_ref, o_ref):
    """o = x + pe, with pe broadcast along the (lane) embedding axis.

    pe_ref: (1, TS, 1)  f32  precomputed sin/cos per (batch, position)
    x_ref : (1, TS, TD)
    o_ref : (1, TS, TD)
    """
    o_ref[...] = x_ref[...] + pe_ref[...].astype(o_ref.dtype)


def positional_encoding(x, mz, *, seq_tile=None, d_tile=None, donate_x=False):
    """Pallas implementation of PositionalEncoding.forward (eval mode).

    x : (B, S, D)
    mz: (B, S)
    seq_tile / d_tile: optional tile overrides (mainly for testing).
    donate_x: alias x's buffer into the output (only if the caller discards x).
    """
    B, S, D = x.shape
    itemsize = jnp.dtype(x.dtype).itemsize

    # ---- host-side pe column: one sin/cos per (batch, position) ----------------
    # Tiny (B*S f32) compared to the streamed x/out bytes; exact cos, no phase trick.
    s_idx = jnp.arange(S, dtype=jnp.int32)
    div_term = jnp.exp((2 * (s_idx // 2)).astype(jnp.float32)
                       * (-math.log(10000.0) / float(D)))          # div_term[s//2]
    angle = mz.astype(jnp.float32) * div_term[None, :]              # (B, S)
    pe_col = jnp.where((s_idx % 2) == 0, jnp.sin(angle), jnp.cos(angle))
    pe_col = pe_col.reshape(B, S, 1)

    # ---- tile selection ---------------------------------------------------------
    X_BLOCK_TARGET = 4 * 1024 * 1024     # ~4 MiB x block: near the roofline plateau
    VMEM_BUDGET = 40 * 1024 * 1024       # target double-buffered footprint
    PE_ROW_BYTES = 128 * 4               # (ts, 1) f32 column lane-pads to 128 lanes

    # D tile: full D unless even a minimal 8-row block would blow the budget.
    if d_tile is not None:
        td = min(d_tile, D)
    elif D % 128 == 0 and 4 * 8 * D * itemsize > VMEM_BUDGET:
        td = max(128, (VMEM_BUDGET // (4 * 8 * itemsize)) // 128 * 128)
    else:
        td = D
    if td < D:
        assert td % 128 == 0, "D tiles must be lane-dense (multiples of 128)"

    # S tile.
    if seq_tile is not None:
        ts = seq_tile
    else:
        row_x = td * itemsize
        ts = X_BLOCK_TARGET // max(1, row_x)
        # keep the double-buffered (x + out + pe column) footprint under budget
        ts = min(ts, VMEM_BUDGET // (2 * (2 * row_x + PE_ROW_BYTES)))
        # keep >= ~4 grid steps so v7x's two TensorCores / megacore get work
        per_batch = pl.cdiv(4, B)
        if per_batch > 1:
            ts = min(ts, pl.cdiv(S, per_batch))
    if ts >= S:
        ts = S                            # single full-extent block: always legal
    else:
        ts = max(8, (ts // 8) * 8)        # interior blocks: sublane multiple of 8

    grid = (B, pl.cdiv(S, ts), pl.cdiv(D, td))

    # Explicit scoped-VMEM limit: actual footprint + headroom, capped for v7x.
    x_block = ts * td * itemsize
    pe_block = ts * PE_ROW_BYTES
    need = 2 * (2 * x_block + pe_block)
    vmem_limit = min(48 * 1024 * 1024, max(16 * 1024 * 1024, int(need * 1.5)))

    cost = pl.CostEstimate(
        flops=B * S * D,                                   # one add per element
        transcendentals=0,                                 # sin/cos hoisted to wrapper
        bytes_accessed=2 * B * S * D * itemsize + B * S * 4)

    extra = {}
    if donate_x:
        extra["input_output_aliases"] = {1: 0}             # x (input 1) -> output 0

    out = pl.pallas_call(
        _add_pe_kernel,
        out_shape=jax.ShapeDtypeStruct((B, S, D), x.dtype),
        grid=grid,
        in_specs=[
            pl.BlockSpec((1, ts, 1), lambda b, si, di: (b, si, 0)),    # pe column
            pl.BlockSpec((1, ts, td), lambda b, si, di: (b, si, di)),  # x tile
        ],
        out_specs=pl.BlockSpec((1, ts, td), lambda b, si, di: (b, si, di)),
        compiler_params=pltpu.CompilerParams(
            dimension_semantics=("parallel", "parallel", "parallel"),
            vmem_limit_bytes=vmem_limit),
        cost_estimate=cost,
        **extra,
    )(pe_col, x)

    # TODO(synk): nn.Dropout(p) in training mode (random masking + 1/(1-p) scale)
    # is not applied; forward is reproduced in eval mode (dropout = identity).
    return out


def _reference(x, mz):
    """Pure-JAX reference mirroring the PyTorch forward exactly."""
    B, S, D = x.shape
    pe = jnp.zeros_like(x)
    div_term = jnp.exp(jnp.arange(0, S, 2, dtype=jnp.float32)
                       * -(math.log(10000.0) / D))
    pos_even = mz[:, 0::2]
    pe = pe.at[:, 0::2, :].set(
        jnp.sin(pos_even * div_term[: pos_even.shape[1]])[:, :, None]
        * jnp.ones((1, 1, D), x.dtype))
    pos_odd = mz[:, 1::2]
    pe = pe.at[:, 1::2, :].set(
        jnp.cos(pos_odd * div_term[: pos_odd.shape[1]])[:, :, None]
        * jnp.ones((1, 1, D), x.dtype))
    return x + pe


if __name__ == "__main__":
    base_key = jax.random.PRNGKey(0)

    def run_case(B, S, D, **kw):
        kx, kmz = jax.random.split(jax.random.fold_in(base_key, 1000 * S + 7 * D + B))
        x = jax.random.normal(kx, (B, S, D), dtype=jnp.float32)
        mz = jax.random.uniform(kmz, (B, S), dtype=jnp.float32,
                                minval=0.0, maxval=100.0)
        out = jax.block_until_ready(positional_encoding(x, mz, **kw))
        ref = _reference(x, mz)
        assert out.shape == (B, S, D)
        assert jnp.allclose(out, ref, atol=2e-6, rtol=1e-6), f"mismatch at {(B, S, D)}"

    # Small shape matching the module's (B, S, D) convention.
    run_case(2, 8, 32)
    # Lane-dense D with a ragged sequence tail handled by a masked boundary block
    # (no jnp.pad / output slice round-trips).
    run_case(2, 21, 128, seq_tile=8)
    # D-tiling path (3-axis grid) with lane-dense D tiles.
    run_case(1, 16, 256, seq_tile=8, d_tile=128)

    print("KERNEL_OK")
</pallas_src>

<mosaic_0001>
module attributes {stable_mosaic.version = 11 : i64} {
  func.func @_add_pe_kernel(%arg0: i32, %arg1: i32, %arg2: i32, %arg3: memref<1x8x1xf32, #tpu.memory_space<vmem>>, %arg4: memref<1x8x32xf32, #tpu.memory_space<vmem>>, %arg5: memref<1x8x32xf32, #tpu.memory_space<vmem>>) attributes {dimension_semantics = [#tpu.dimension_semantics<parallel>, #tpu.dimension_semantics<parallel>, #tpu.dimension_semantics<parallel>], iteration_bounds = array<i64: 2, 1, 1>, scalar_prefetch = 0 : i64, scratch_operands = 0 : i64, tpu.core_type = #tpu.core_type<tc>, window_params = [{transform_indices = @transform_0, window_bounds = array<i64: 1, 8, 1>}, {transform_indices = @transform_1, window_bounds = array<i64: 1, 8, 32>}, {transform_indices = @transform_2, window_bounds = array<i64: 1, 8, 32>}]} {
    %c0 = arith.constant 0 : index
    %c0_0 = arith.constant 0 : index
    %c0_1 = arith.constant 0 : index
    %0 = vector.load %arg4[%c0, %c0_0, %c0_1] : memref<1x8x32xf32, #tpu.memory_space<vmem>>, vector<1x8x32xf32>
    %c0_2 = arith.constant 0 : index
    %c0_3 = arith.constant 0 : index
    %c0_4 = arith.constant 0 : index
    %1 = vector.load %arg3[%c0_2, %c0_3, %c0_4] : memref<1x8x1xf32, #tpu.memory_space<vmem>>, vector<1x8x1xf32>
    %2 = vector.broadcast %1 : vector<1x8x1xf32> to vector<1x8x32xf32>
    %3 = arith.addf %0, %2 : vector<1x8x32xf32>
    %c0_5 = arith.constant 0 : index
    %c0_6 = arith.constant 0 : index
    %c0_7 = arith.constant 0 : index
    %4 = vector.load %arg5[%c0_5, %c0_6, %c0_7] : memref<1x8x32xf32, #tpu.memory_space<vmem>>, vector<1x8x32xf32>
    tpu.vector_store %arg5[%c0_5, %c0_6, %c0_7], %3 {strides = array<i32>} : memref<1x8x32xf32, #tpu.memory_space<vmem>>, vector<1x8x32xf32>,
    return
  }
  func.func @transform_0(%arg0: i32, %arg1: i32, %arg2: i32) -> (i32, i32, i32) {
    %c0_i32 = arith.constant 0 : i32
    %c0_i32_0 = arith.constant 0 : i32
    return %arg0, %arg1, %c0_i32 : i32, i32, i32
  }
  func.func @transform_1(%arg0: i32, %arg1: i32, %arg2: i32) -> (i32, i32, i32) {
    %c0_i32 = arith.constant 0 : i32
    return %arg0, %arg1, %arg2 : i32, i32, i32
  }
  func.func @transform_2(%arg0: i32, %arg1: i32, %arg2: i32) -> (i32, i32, i32) {
    %c0_i32 = arith.constant 0 : i32
    return %arg0, %arg1, %arg2 : i32, i32, i32
  }
}

</mosaic_0001>

<bundles_post_ra>
// kernel: tpu_custom_call.1
= control target key start
LH: loop header
LB: loop body
LE: loop exit
PB: predicated region body
PF: predicated region fallthrough
CT: control target
= control target key end

     0   :  { %7 = vsyncpa [#allocation3], 0  ;;  %s612_s0 = inlined_call_operand.vmem [shape: f32[2,8,1], index: 0, kind: input, shape index: {}]   ;;  %s613_s1 = inlined_call_operand.vmem [shape: f32[2,8,32], index: 1, kind: input, shape index: {}]   ;;  %s614_s2 = inlined_call_operand.hbm [shape: f32[2,8,32], index: 2, kind: output, shape index: {}]  }
   0x1   :  { %9 = vsyncpa [#allocation3 + $0x1], 0  ;;  %s497_s9 = smov 0   ;;  %s499_s10 = smov 0  }
   0x2   :  { %s501_s11 = smov 0   ;;  %s503_s12 = smov 0  }
   0x3   :  { %s505_s13 = smov 0   ;;  %s507_s14 = smov 0  }
   0x4 LB: > { %s331_s15 = sadd.s32 4294967295, %s478_s14   ;;  %s332_s16 = sadd.s32 4294967294, %s478_s14   ;;  %s478_s14 = sphi %s507_s14, %s15_s14   ;;  %s474_s13 = sphi %s505_s13, %s621_s13   ;;  %s470_s12 = sphi %s503_s12, %s620_s12   ;;  %s466_s11 = sphi %s501_s11, %s619_s11   ;;  %s462_s10 = sphi %s499_s10, %s618_s10   ;;  %s458_s9 = sphi %s497_s9, %s617_s9  }
   0x5   : > { %s34_s17 = sadd.s32 1, %s474_s13  ;;  %s103_s18 = sadd.s32 1, %s466_s11 }
   0x6   : > { %p36_p0 = scmp.ge.s32.totalorder %s34_s17, 2  ;;  %p113_p1 = scmp.ne.s32.totalorder %s466_s11, %s462_s10 }
   0x7   : > { %p114_p2 = scmp.eq.s32.totalorder %s331_s15, 1  ;;  %p119_p3 = scmp.ne.s32.totalorder %s462_s10, %s458_s9 }
   0x8   : > { %s623_s17 = smov (%p36_p0, %s34_s17), 0  ;;  %p120_p5 = scmp.eq.s32.totalorder %s332_s16, 1 }
   0x9   : > { %p537_p4 = por %p114_p2, %p113_p1  ;;  %s96_s20 = ssub.s32 %s474_s13, %s623_s17 }
   0xa   : > { %p335_p6 = scmp.ge.s32.totalorder %s478_s14, 1  ;;  %p101_p7 = scmp.eq.s32.totalorder %s96_s20, 0 }
   0xb   : > { %p544_p8 = por %p120_p5, %p119_p3  ;;  %p161_p9 = scmp.lt.s32.totalorder %s478_s14, 3 }
   0xc   : > { %s550_s22 = scalar_select %p101_p7, %s466_s11, %s103_s18  }
   0xd   : > { %p162_p10 = pnand %p335_p6, %p161_p9 }
   0xe   : > { %p195_p11 = scmp.lt.s32.totalorder (!%p162_p10), %s470_s12, 1  ;;  %v480_v0 = vmov (!%p162_p10), 0   ;;  %s192_s28 = sand.u32 (!%p162_p10), 1, %s462_s10   ;;  %vm220_vm0 = vcmask (!%p162_p10), 261120  }
   0xf   : > { %165 = sbr.rel (%p162_p10) target bundleno = 171 (0xab), region = 28  ;;  %399 = vset.pattern.permute.xlu0 (!%p162_p10), %v480_v0  ;;  %s336_s29 = sshll.u32 (!%p162_p10), %s192_s28, 3 }
  0x10   : > { %s340_s5 = sshll.u32 (!%p162_p10), %s470_s12, 7  ;;  %s194_s6 = scalar_lea.vmem (!%p162_p10), [#allocation2], %s336_s29 }
  0x11   : > { %s238_s7 = sshll.u32 (!%p162_p10), %s194_s6, 4  ;;  %s565_s16 = scalar_lea.hbm (!%p162_p10), %s614_s2, %s340_s5  ;;  %s567_s7 = int_to_ptr.vmem [resolvable:$true] %s238_s7 }
  0x12   : > { %s223_s18 = scalar_lea.sflag (!%p162_p10), [#allocation3], %s192_s28  ;;  %s400_s20 = scalar_lea.vmem (!%p162_p10), %s567_s7, 128 }
  0x13   : > { %p401_p12 = scmp.ne.s32.totalorder (!%p162_p10), %s567_s7, %s400_s20 }
  0x15   : > { %p402_p13 = pnand (!%p162_p10), %p401_p12, %p537_p4 }
  0x16   : > { %s196_s23 = scalar_select %p195_p11, %s470_s12, 1 }
  0x17   : > { %p403_p0 = pneg %p402_p13  ;;  %s481_s12 = smov [#allocation2]  }
  0x18   : > { %s337_s24 = sshll.u32 %s196_s23, 3  ;;  %s404_s23 = sshll.u32 %s481_s12, 4  ;;  %s405_s23 = int_to_ptr.vmem [resolvable:$false] %s404_s23 }
  0x19   : > { %s201_s27 = scalar_lea.vmem %s612_s0, %s337_s24  ;;  %s211_s4 = scalar_lea.vmem %s613_s1, %s337_s24 }
  0x1a   : > { %v213_v1 = vld [vmem:[%s201_s27] sm:$0xff]  ;;  %s406_s24 = scalar_lea.vmem %s405_s23, 256  ;;  %p407_p1 = scmp.lt.s32.totalorder %s567_s7, %s405_s23 }
  0x1b   : > { %216 = vperm.xlu0 %399, %v213_v1   ;;  %v212_v2 = vld [vmem:[%s211_s4] sm:$0xff]  ;;  %p408_p2 = scmp.lt.s32.totalorder %s406_s24, %s400_s20 }
  0x1d   : > { %p409_p3 = por %p408_p2, %p407_p1 }
  0x1f   : > { %p410_p5 = pnand %p409_p3, %p403_p0 }
  0x9a   : > { %v217_v3 = vpop.permute.xlu0 %216 }
  0x9b   : > { %v219_v4 = vadd.f32 %v217_v3, %v212_v2 }
  0x9d   : > { %221 = vst.msk [vmem:[%s194_s6] sm:$0xff] %vm220_vm0, %v219_v4 }
  0x9e   : > { %413 = shalt.err (!%p410_p5)
}
  0x9f   : > { %s414_s25 = scalar_lea.hbm %s565_s16, 128  ;;  %s418_s28 = scalar_lea.hbm %s614_s2, 256 }
  0xa0   : > { %p415_p6 = scmp.ne.s32.totalorder %s565_s16, %s414_s25  ;;  %p419_p10 = scmp.lt.u32.totalorder %s565_s16, %s614_s2 }
  0xa1   : > { %p420_p11 = scmp.lt.u32.totalorder %s418_s28, %s414_s25  ;;  %p422_p13 = scmp.lt.u32.totalorder %s414_s25, %s565_s16 }
  0xa2   : > { %p416_p7 = pnand %p415_p6, %p537_p4 }
  0xa3   : > { %p421_p12 = por %p420_p11, %p419_p10 }
  0xa4   : > { %p417_p9 = pneg %p416_p7 }
  0xa5   : > { %p423_p0 = por %p422_p13, %p421_p12 }
  0xa7   : > { %p424_p1 = pnand %p423_p0, %p417_p9 }
  0xa9   : > { %427 = shalt.err (!%p424_p1)
}
  0xaa   : > { %343 = dma.vmem_to_hbm [thread:$0]  (%p537_p4), %s567_s7, 128, %s565_s16, %s223_s18  }
  0xab PF: > { %p349_p2 = scmp.ge.s32.totalorder %s478_s14, 2  ;;  %s250_s3 = sand.u32 1, %s458_s9  }
  0xac   : > { %s251_s4 = scalar_lea.sflag [#allocation3], %s250_s3 }
  0xad   : > { %p346_p3 = pnand %p349_p2, %p544_p8 }
  0xaf   : > { %453 = dma.done.wait (!%p346_p3), %s251_s4, 128  }
  0xb0   : > { %455 = vsyncadd (!%p346_p3), %s251_s4, 4294967168  ;;  %s15_s14 = sadd.s32 1, %s478_s14   ;;  %s617_s9 = smov %s462_s10 }
  0xb1   : > { %p12_p5 = scmp.ge.s32.totalorder %s15_s14, 4   ;;  %s618_s10 = smov %s466_s11 }
  0xb2   : > { %s619_s11 = smov %s550_s22  ;;  %s620_s12 = smov %s474_s13 }
  0xb3   : > { %s621_s13 = smov %s623_s17  ;;  %14 = sbr.rel (!%p12_p5) target bundleno = 4 (0x4), region = 66 }
  0xba   :  { %256 = vsyncpa [#allocation3], 1 }
  0xbb   :  { %258 = vsyncpa [#allocation3 + $0x1], 1 }

</bundles_post_ra>
